<compile_context>
chip_gen: v7x
topology: tpu7x:2x2x1
jax: 0.10.0
libtpu: 0.0.40
codegen_flags: <defaults>
</compile_context>

<pallas_src>
import functools

import jax
import jax.numpy as jnp
from jax import lax
from jax.experimental import pallas as pl
from jax.experimental.pallas import tpu as pltpu

MARGIN = 0.2            # module default
_LANES = 128
_SUBLANES = 8
_VMEM_LIMIT = 40 * 1024 * 1024     # > scoped defaults (16 MiB v5e / 32 MiB v6e,v7x), < v7x physical
_SLAB_BUDGET = 8 * 1024 * 1024     # target for the per-chunk mining temporaries


def _round_up(x, m):
    return ((x + m - 1) // m) * m


# --------------------------------------------------------------------------- kernel 1
def _pdist_kernel(er_ref, ec_ref, sqc_ref, sqr_ref, d_ref, *, block_m, block_n):
    """One (TM, TNc) tile of the euclidean distance matrix (squared=False)."""
    i = pl.program_id(0)
    j = pl.program_id(1)
    # (TM, Dp) x (TNc, Dp) -> (TM, TNc): contract the feature dims directly (no
    # materialized transpose), f32 accumulation on the MXU.
    gram = lax.dot_general(er_ref[...], ec_ref[...],
                           dimension_numbers=(((1,), (1,)), ((), ())),
                           preferred_element_type=jnp.float32)
    dist2 = (sqr_ref[...] - 2.0 * gram) + sqc_ref[...]            # (TM, TNc)
    row_ids = lax.broadcasted_iota(jnp.int32, dist2.shape, 0) + i * block_m
    col_ids = lax.broadcasted_iota(jnp.int32, dist2.shape, 1) + j * block_n
    # Force an exact 0 diagonal (torch parity; avoids fp-cancellation residue).
    dist2 = jnp.where(row_ids == col_ids, 0.0, jnp.maximum(dist2, 0.0))
    zero_mask = (dist2 == 0.0).astype(jnp.float32)
    d_ref[...] = (1.0 - zero_mask) * jnp.sqrt(dist2 + zero_mask * 1e-16)


# --------------------------------------------------------------------------- kernel 2
def _mining_kernel(d_ref, lab_row_ref, lab_col_ref, num_ref, pos_ref, *,
                   block_a, chunk_n, b_valid, margin):
    """Easy semi-hard mining for one block of TA anchor rows of the distance matrix."""
    TA = block_a
    Bp = d_ref.shape[1]
    TN = chunk_n
    n_chunks = Bp // TN
    a0 = pl.multiple_of(pl.program_id(0) * TA, TA)

    d = d_ref[...]                                    # (TA, Bp) f32
    lab_row = lab_row_ref[...]                        # (1, Bp)
    lab_col = lab_col_ref[...]                        # (TA, 1)

    row_ids = lax.broadcasted_iota(jnp.int32, (TA, Bp), 0) + a0
    col_ids = lax.broadcasted_iota(jnp.int32, (TA, Bp), 1)
    valid_col = col_ids < b_valid                     # padded candidate / positive cols
    valid_row = row_ids < b_valid                     # padded anchor rows
    eye_blk = row_ids == col_ids

    labels_eq = lab_col == lab_row                                         # (TA, Bp)
    mask_pos_f = (labels_eq & jnp.logical_not(eye_blk)
                  & valid_col & valid_row).astype(jnp.float32)
    adjn = jnp.logical_not(labels_eq) & valid_col                          # negatives
    adjn_f = adjn.astype(jnp.float32)

    # Row stats.  Padded columns are replaced by 0 for the max; the min/max shifts are
    # algebraically cancelled by the masked-min/max trick, so this matches the
    # unpadded torch math exactly (the diagonal 0 is always a valid column).
    d_valid = jnp.where(valid_col, d, 0.0)
    row_max = jnp.max(d_valid, axis=1, keepdims=True)                     # (TA, 1)
    row_min = jnp.min(d_valid, axis=1, keepdims=True)                     # (TA, 1)

    # negatives_inside = _masked_maximum(pdist, adjacency_not)
    neg_in = jnp.max((d - row_min) * adjn_f, axis=1, keepdims=True) + row_min   # (TA,1)

    # mask_final: exists a negative n with d[a,n] > d[a,i]  <=>  max-negative > d[a,i],
    # i.e. neg_in > d.  (When no negatives exist, neg_in == 0 <= d, so it is False, as
    # in the reference.)  This needs no (TA, Bp, TN) reduction at all.
    has_greater = neg_in > d                                              # (TA, Bp)

    # negatives_outside = _masked_minimum(pdist_tile, mask): chunked over the candidate
    # axis with a running (TA, Bp) min so the live 3-D slab is only (TA, Bp, TN).
    def chunk_body(c, run_min):
        n0 = pl.multiple_of(c * TN, TN)
        cand = d_ref[:, pl.ds(n0, TN)]                                    # (TA, TN)
        lab_n = lab_row_ref[:, pl.ds(n0, TN)]                             # (1, TN)
        n_ids = lax.broadcasted_iota(jnp.int32, (1, TN), 1) + n0
        adjn_c = (lab_col != lab_n) & (n_ids < b_valid)                   # (TA, TN)
        # [a, i, n]: candidate negative n for anchor a at threshold column i.
        mask3 = adjn_c[:, None, :] & (cand[:, None, :] > d[:, :, None])   # (TA, Bp, TN)
        masked = jnp.where(mask3, cand[:, None, :] - row_max[:, :, None], 0.0)
        return jnp.minimum(run_min, jnp.min(masked, axis=2))

    run_min = lax.fori_loop(0, n_chunks, chunk_body,
                            jnp.zeros((TA, Bp), jnp.float32),
                            unroll=n_chunks <= 4)
    neg_out = run_min + row_max                                           # (TA, Bp)

    semi = jnp.where(has_greater, neg_out, neg_in)                        # (TA, Bp)
    loss_mat = margin + d - semi
    part_num = jnp.sum(jnp.maximum(loss_mat * mask_pos_f, 0.0))
    part_pos = jnp.sum(mask_pos_f)

    # Lane-dense partial-sum blocks (one per grid step); reduced in the wrapper.
    num_ref[...] = jnp.full(num_ref.shape, part_num, dtype=jnp.float32)
    pos_ref[...] = jnp.full(pos_ref.shape, part_pos, dtype=jnp.float32)


# --------------------------------------------------------------------------- wrapper
def triplet_loss_pallas(labels, embeddings, margin=MARGIN):
    B, D = embeddings.shape

    # Pad to tiling-friendly sizes; padded rows/cols are masked out in-kernel.
    if B > _LANES:
        Bp = _round_up(B, _LANES)          # lane-dense 128-wide candidate chunks
    else:
        Bp = _round_up(max(B, _SUBLANES), _SUBLANES)
    Dp = _round_up(D, _LANES)

    emb = jnp.pad(embeddings.astype(jnp.float32), ((0, Bp - B), (0, Dp - D)))
    lab = jnp.pad(labels.astype(jnp.int32), (0, Bp - B), constant_values=-1)

    # Hoisted squared norms (computed once; streamed as blocks, never recomputed).
    sq = jnp.sum(emb * emb, axis=1)
    sq_col = sq.reshape(Bp, 1)
    sq_row = sq.reshape(1, Bp)

    # ---- kernel 1: full (Bp, Bp) euclidean distance matrix, MXU-shaped tiles ----
    tnc = _LANES if Bp % _LANES == 0 else Bp
    tm = next(t for t in (128, 64, 32, 16, 8) if Bp % t == 0)
    pdist = pl.pallas_call(
        functools.partial(_pdist_kernel, block_m=tm, block_n=tnc),
        grid=(Bp // tm, Bp // tnc),
        in_specs=[
            pl.BlockSpec((tm, Dp), lambda i, j: (i, 0)),      # anchor rows
            pl.BlockSpec((tnc, Dp), lambda i, j: (j, 0)),     # candidate rows
            pl.BlockSpec((tm, 1), lambda i, j: (i, 0)),       # ||e_a||^2 (column form)
            pl.BlockSpec((1, tnc), lambda i, j: (0, j)),      # ||e_n||^2 (row form)
        ],
        out_specs=pl.BlockSpec((tm, tnc), lambda i, j: (i, j)),
        out_shape=jax.ShapeDtypeStruct((Bp, Bp), jnp.float32),
        compiler_params=pltpu.CompilerParams(
            dimension_semantics=("parallel", "parallel"),
            vmem_limit_bytes=_VMEM_LIMIT),
    )(emb, emb, sq_col, sq_row)

    # ---- kernel 2: Easy semi-hard mining over anchor-row blocks of pdist ----
    tn = _LANES if Bp % _LANES == 0 else Bp                   # candidate chunk width
    ta = _SUBLANES                                            # anchor rows per step
    for t in (256, 128, 64, 32, 16, 8):
        # keep ~2 live (ta, Bp, tn) f32 chunk slabs inside the VMEM budget
        if Bp % t == 0 and 2 * t * Bp * tn * 4 <= _SLAB_BUDGET:
            ta = t
            break
    # TODO(synk): for extremely large B (where even ta=8 chunk slabs exceed the budget)
    # the threshold (i) axis would also need chunking; not implemented.
    G = Bp // ta

    num, pos = pl.pallas_call(
        functools.partial(_mining_kernel, block_a=ta, chunk_n=tn,
                          b_valid=B, margin=float(margin)),
        grid=(G,),
        in_specs=[
            pl.BlockSpec((ta, Bp), lambda g: (g, 0)),         # distance rows
            pl.BlockSpec((1, Bp), lambda g: (0, 0)),          # labels, row form
            pl.BlockSpec((ta, 1), lambda g: (g, 0)),          # labels, column form
        ],
        out_specs=[
            pl.BlockSpec((1, _SUBLANES, _LANES), lambda g: (g, 0, 0)),
            pl.BlockSpec((1, _SUBLANES, _LANES), lambda g: (g, 0, 0)),
        ],
        out_shape=[
            jax.ShapeDtypeStruct((G, _SUBLANES, _LANES), jnp.float32),
            jax.ShapeDtypeStruct((G, _SUBLANES, _LANES), jnp.float32),
        ],
        compiler_params=pltpu.CompilerParams(
            dimension_semantics=("parallel",),
            vmem_limit_bytes=_VMEM_LIMIT),
    )(pdist, lab.reshape(1, Bp), lab.reshape(Bp, 1))

    return jnp.sum(num[:, 0, 0]) / (jnp.sum(pos[:, 0, 0]) + 1e-8)


# --------------------------------------------------------------------------- reference
def triplet_loss_ref(labels, embeddings, margin=MARGIN):
    """Pure-JAX reference mirroring the torch code line-by-line (Easy difficulty)."""
    emb = embeddings.astype(jnp.float32)
    dot = emb @ emb.T
    sn = jnp.diag(dot)
    dist2 = jnp.maximum(sn[None, :] - 2.0 * dot + sn[:, None], 0.0)
    zm = (dist2 == 0.0).astype(jnp.float32)
    d = (1.0 - zm) * jnp.sqrt(dist2 + zm * 1e-16)
    B = labels.shape[0]
    labels_equal = labels[None, :] == labels[:, None]
    adjacency_not = ~labels_equal
    pdist_tile = jnp.tile(d, (B, 1))
    mask = jnp.tile(adjacency_not, (B, 1)) & (pdist_tile > d.T.reshape(-1, 1))
    mask_f = mask.astype(jnp.float32)
    mask_final = (jnp.sum(mask_f, axis=1, keepdims=True) > 0.0).reshape(B, B).T
    axis_max = jnp.max(pdist_tile, axis=1, keepdims=True)
    neg_out = (jnp.min((pdist_tile - axis_max) * mask_f, axis=1, keepdims=True)
               + axis_max).reshape(B, B).T
    adjn_f = adjacency_not.astype(jnp.float32)
    axis_min = jnp.min(d, axis=1, keepdims=True)
    neg_in = jnp.max((d - axis_min) * adjn_f, axis=1, keepdims=True) + axis_min
    neg_in = jnp.tile(neg_in, (1, B))
    semi = jnp.where(mask_final, neg_out, neg_in)
    loss_mat = margin + d - semi
    mask_pos = (labels_equal & ~jnp.eye(B, dtype=bool)).astype(jnp.float32)
    num_pos = jnp.sum(mask_pos)
    return jnp.sum(jnp.maximum(loss_mat * mask_pos, 0.0)) / (num_pos + 1e-8)


# TODO(synk): Difficulty.Hard / Difficulty.SemiHard branches and the cosine=True
# distance are not exercised by the module defaults (Easy + euclidean) and are not
# implemented here.

if __name__ == "__main__":
    key = jax.random.PRNGKey(0)
    B, D = 8, 32
    # bf16-representable test data: the kernel is fp32 end-to-end, but using exactly
    # bf16-representable inputs makes the MXU (Pallas) and XLA (reference) f32 matmuls
    # produce near-identical products regardless of internal pass count, so the
    # comparison below is tight and free of mining-selection flips from fp ties.
    embeddings = jax.random.normal(key, (B, D), dtype=jnp.float32)
    embeddings = embeddings.astype(jnp.bfloat16).astype(jnp.float32)
    labels = jnp.array([0, 0, 1, 1, 2, 2, 3, 3], dtype=jnp.int32)

    loss = jax.block_until_ready(triplet_loss_pallas(labels, embeddings))
    ref = jax.block_until_ready(triplet_loss_ref(labels, embeddings))

    assert abs(float(loss) - float(ref)) < 2e-3 * max(1.0, abs(float(ref))), (
        float(loss), float(ref))

    print("KERNEL_OK")
</pallas_src>

<mosaic_0001>
module attributes {stable_mosaic.version = 11 : i64} {
  func.func @_pdist_kernel(%arg0: i32, %arg1: i32, %arg2: memref<8x128xf32, #tpu.memory_space<vmem>>, %arg3: memref<8x128xf32, #tpu.memory_space<vmem>>, %arg4: memref<8x1xf32, #tpu.memory_space<vmem>>, %arg5: memref<1x8xf32, #tpu.memory_space<vmem>>, %arg6: memref<8x8xf32, #tpu.memory_space<vmem>>) attributes {dimension_semantics = [#tpu.dimension_semantics<parallel>, #tpu.dimension_semantics<parallel>], iteration_bounds = array<i64: 1, 1>, scalar_prefetch = 0 : i64, scratch_operands = 0 : i64, tpu.core_type = #tpu.core_type<tc>, window_params = [{transform_indices = @transform_0, window_bounds = array<i64: 8, 128>}, {transform_indices = @transform_1, window_bounds = array<i64: 8, 128>}, {transform_indices = @transform_2, window_bounds = array<i64: 8, 1>}, {transform_indices = @transform_3, window_bounds = array<i64: 1, 8>}, {transform_indices = @transform_4, window_bounds = array<i64: 8, 8>}]} {
    %c0 = arith.constant 0 : index
    %c0_0 = arith.constant 0 : index
    %0 = vector.load %arg2[%c0, %c0_0] : memref<8x128xf32, #tpu.memory_space<vmem>>, vector<8x128xf32>
    %c0_1 = arith.constant 0 : index
    %c0_2 = arith.constant 0 : index
    %1 = vector.load %arg3[%c0_1, %c0_2] : memref<8x128xf32, #tpu.memory_space<vmem>>, vector<8x128xf32>
    %cst = arith.constant dense<0.000000e+00> : vector<8x8xf32>
    %2 = tpu.matmul %0, %1, %cst {dimension_numbers = #tpu.dot_dimension_numbers<[1], [1], [0], [0], [0, 0, 1, 0], [], []>} : vector<8x128xf32>, vector<8x128xf32>, vector<8x8xf32> -> vector<8x8xf32>
    %c0_3 = arith.constant 0 : index
    %c0_4 = arith.constant 0 : index
    %3 = vector.load %arg5[%c0_3, %c0_4] : memref<1x8xf32, #tpu.memory_space<vmem>>, vector<1x8xf32>
    %cst_5 = arith.constant 2.000000e+00 : f32
    %4 = vector.broadcast %cst_5 : f32 to vector<8x8xf32>
    %5 = arith.mulf %4, %2 : vector<8x8xf32>
    %6 = vector.broadcast %3 : vector<1x8xf32> to vector<8x8xf32>
    %7 = arith.subf %6, %5 : vector<8x8xf32>
    %c0_6 = arith.constant 0 : index
    %c0_7 = arith.constant 0 : index
    %8 = vector.load %arg4[%c0_6, %c0_7] : memref<8x1xf32, #tpu.memory_space<vmem>>, vector<8x1xf32>
    %9 = vector.broadcast %8 : vector<8x1xf32> to vector<8x8xf32>
    %10 = arith.addf %7, %9 : vector<8x8xf32>
    %11 = tpu.iota {dimensions = array<i32: 0>} : vector<8x8xi32>
    %c8_i32 = arith.constant 8 : i32
    %12 = arith.muli %arg0, %c8_i32 : i32
    %13 = vector.broadcast %12 : i32 to vector<8x8xi32>
    %14 = arith.addi %11, %13 : vector<8x8xi32>
    %15 = tpu.iota {dimensions = array<i32: 1>} : vector<8x8xi32>
    %c8_i32_8 = arith.constant 8 : i32
    %16 = arith.muli %arg1, %c8_i32_8 : i32
    %17 = vector.broadcast %16 : i32 to vector<8x8xi32>
    %18 = arith.addi %15, %17 : vector<8x8xi32>
    %19 = arith.cmpi eq, %14, %18 : vector<8x8xi32>
    %cst_9 = arith.constant 0.000000e+00 : f32
    %20 = vector.broadcast %cst_9 : f32 to vector<8x8xf32>
    %21 = arith.maximumf %10, %20 : vector<8x8xf32>
    %cst_10 = arith.constant 0.000000e+00 : f32
    %22 = vector.broadcast %cst_10 : f32 to vector<8x8xf32>
    %23 = arith.select %19, %22, %21 : vector<8x8xi1>, vector<8x8xf32>
    %cst_11 = arith.constant 0.000000e+00 : f32
    %24 = vector.broadcast %cst_11 : f32 to vector<8x8xf32>
    %25 = arith.cmpf oeq, %23, %24 : vector<8x8xf32>
    %26 = arith.extui %25 : vector<8x8xi1> to vector<8x8xi32>
    %27 = arith.sitofp %26 : vector<8x8xi32> to vector<8x8xf32>
    %cst_12 = arith.constant 1.000000e+00 : f32
    %28 = vector.broadcast %cst_12 : f32 to vector<8x8xf32>
    %29 = arith.subf %28, %27 : vector<8x8xf32>
    %cst_13 = arith.constant 1.000000e-16 : f32
    %30 = vector.broadcast %cst_13 : f32 to vector<8x8xf32>
    %31 = arith.mulf %27, %30 : vector<8x8xf32>
    %32 = arith.addf %23, %31 : vector<8x8xf32>
    %33 = math.sqrt %32 : vector<8x8xf32>
    %34 = arith.mulf %29, %33 : vector<8x8xf32>
    %c0_14 = arith.constant 0 : index
    %c0_15 = arith.constant 0 : index
    %35 = vector.load %arg6[%c0_14, %c0_15] : memref<8x8xf32, #tpu.memory_space<vmem>>, vector<8x8xf32>
    tpu.vector_store %arg6[%c0_14, %c0_15], %34 {strides = array<i32>} : memref<8x8xf32, #tpu.memory_space<vmem>>, vector<8x8xf32>,
    return
  }
  func.func @transform_0(%arg0: i32, %arg1: i32) -> (i32, i32) {
    %c0_i32 = arith.constant 0 : i32
    %c0_i32_0 = arith.constant 0 : i32
    return %arg0, %c0_i32 : i32, i32
  }
  func.func @transform_1(%arg0: i32, %arg1: i32) -> (i32, i32) {
    %c0_i32 = arith.constant 0 : i32
    %c0_i32_0 = arith.constant 0 : i32
    return %arg1, %c0_i32 : i32, i32
  }
  func.func @transform_2(%arg0: i32, %arg1: i32) -> (i32, i32) {
    %c0_i32 = arith.constant 0 : i32
    %c0_i32_0 = arith.constant 0 : i32
    return %arg0, %c0_i32 : i32, i32
  }
  func.func @transform_3(%arg0: i32, %arg1: i32) -> (i32, i32) {
    %c0_i32 = arith.constant 0 : i32
    %c0_i32_0 = arith.constant 0 : i32
    return %c0_i32, %arg1 : i32, i32
  }
  func.func @transform_4(%arg0: i32, %arg1: i32) -> (i32, i32) {
    %c0_i32 = arith.constant 0 : i32
    return %arg0, %arg1 : i32, i32
  }
}

</mosaic_0001>

<bundles_post_ra>
// kernel: tpu_custom_call.1
= control target key start
LH: loop header
LB: loop body
LE: loop exit
PB: predicated region body
PF: predicated region fallthrough
CT: control target
= control target key end

     0   :  { %9 = vsyncpa [#allocation3], 0  ;;  %s290_s0 = inlined_call_operand.vmem [shape: f32[8,128], index: 0, kind: input, shape index: {}]   ;;  %s291_s1 = inlined_call_operand.hbm [shape: f32[8,128], index: 1, kind: input, shape index: {}]   ;;  %s292_s2 = inlined_call_operand.vmem [shape: f32[8,1], index: 2, kind: input, shape index: {}]   ;;  %s293_s3 = inlined_call_operand.vmem [shape: f32[1,8], index: 3, kind: input, shape index: {}]   ;;  %s294_s4 = inlined_call_operand.hbm [shape: f32[8,8], index: 4, kind: output, shape index: {}]  }
   0x1   :  { %10 = vsyncpa [#allocation4], 0  ;;  %s227_s15 = smov [#allocation2]   ;;  %s179_s19 = scalar_lea.hbm %s291_s1, 128 }
   0x2   :  { %s19_s16 = sshll.u32 %s227_s15, 4  ;;  %p180_p0 = scmp.ne.s32.totalorder %s291_s1, %s179_s19  ;;  %s20_s16 = int_to_ptr.vmem [resolvable:$true] %s19_s16 }
   0x3   :  { %p183_p1 = scmp.lt.u32.totalorder %s179_s19, %s291_s1 }
   0x5   :  { %p185_p2 = pnand %p183_p1, %p180_p0 }
   0x7   :  { %188 = shalt.err (!%p185_p2)
}
   0x8   :  { %s189_s24 = scalar_lea.vmem %s20_s16, 128  ;;  %p194_p4 = scmp.lt.s32.totalorder %s20_s16, %s20_s16 }
   0x9   :  { %p190_p3 = scmp.ne.s32.totalorder %s20_s16, %s189_s24  ;;  %p195_p5 = scmp.lt.s32.totalorder %s189_s24, %s189_s24 }
   0xb   :  { %p196_p6 = por %p195_p5, %p194_p4 }
   0xd   :  { %p197_p7 = pnand %p196_p6, %p190_p3 }
   0xf   :  { %200 = shalt.err (!%p197_p7)
}
  0x10   :  { %22 = dma.hbm_to_vmem [thread:$0]  %s291_s1, 128, %s20_s16, [#allocation3]  }
  0x11   :  { %223 = dma.done.wait [#allocation3], 128  }
  0x12   :  { %224 = vsyncadd [#allocation3], 4294967168  ;;  %v228_v0 = vmov 0.0   ;;  %vm229_vm0 = vmmov 0   ;;  %v230_v1 = vmov 0   ;;  %v31_v2 = vld [vmem:[#allocation2] sm:$0xff]  ;;  %v118_v5 = vlaneseq }
  0x13   :  { %166 = vmatprep.subr.mxu0 %v228_v0  ;;  %168 = vmatprep.mubr.msk.f32.mxu0 %vm229_vm0, %v228_v0  ;;  %v111_v3 = vld [vmem:[%s292_s2] sm:$0xff]  ;;  %vm145_vm5 = vcmask 64512  }
  0x14   :  { %176 = vset.pattern.permute.xlu0 %v230_v1  ;;  %167 = vmatpush3.xpose.msra.mxu0 %v31_v2  ;;  %v30_v4 = vld [vmem:[%s290_s0] sm:$0xff]  ;;  %v119_v10 = vshrl.u32 %v118_v5, 7  ;;  %v124_v11 = vand.u32 127, %v118_v5  ;;  %s231_s0 = smov [#allocation5]  }
  0x15   :  { %114 = vperm.xlu0 %176, %v111_v3   ;;  %v162_v7 = vld [vmem:[%s293_s3] ss:$0 sm:$0xff]  ;;  %s153_s2 = sshll.u32 %s231_s0, 4  ;;  %s154_s2 = int_to_ptr.vmem [resolvable:$true] %s153_s2 }
  0x16   :  { %vm128_vm1 = vcmp.eq.s32.totalorder %v119_v10, %v124_v11  ;;  %s201_s3 = scalar_lea.vmem %s154_s2, 128  ;;  %p206_p9 = scmp.lt.s32.totalorder %s154_s2, %s154_s2 }
  0x17   :  { %169 = vmatmul.mubr.f32.vlgmr.msra.gmra.mrb[0].mxu0 %v30_v4  ;;  %p202_p8 = scmp.ne.s32.totalorder %s154_s2, %s201_s3  ;;  %p207_p10 = scmp.lt.s32.totalorder %s201_s3, %s201_s3 }
  0x19   :  { %p208_p11 = por %p207_p10, %p206_p9 }
  0x1b   :  { %p209_p12 = pnand %p208_p11, %p202_p8 }
  0x94   :  { %v115_v12 = vpop.permute.xlu0 %114 }
  0xea   :  { %v98_v6 = vpop.f32.mrb[0].mxu0 }
  0xeb   :  { %v103_v8 = vmul.f32 2.0, %v98_v6  ;;  %v170_v9 = vpop.f32.mrb[1].mxu0 }
  0xed   :  { %v110_v13 = vsub.f32 %v162_v7, %v103_v8 }
  0xef   :  { %v117_v14 = vadd.f32 %v115_v12, %v110_v13 }
  0xf1   :  { %v129_v15 = vmax.f32 %v117_v14, 0.0 }
  0xf3   :  { %v130_v16 = vsel %vm128_vm1, 0.0, %v129_v15 }
  0xf4   :  { %vm131_vm2 = vcmp.eq.f32.partialorder %v130_v16, 0.0 }
  0xf5   :  { %v163_v17 = vsel %vm131_vm2, 1.0, %v228_v0 }
  0xf6   :  { %v135_v18 = vmul.f32 1e-16, %v163_v17  ;;  %v134_v23 = vsub.f32 1.0, %v163_v17 }
  0xf8   :  { %v136_v19 = vadd.f32 %v135_v18, %v130_v16 }
  0xfa   :  { %177 = vrsqrt.f32 %v136_v19  ;;  %vm139_vm3 = vcmp.eq.f32.partialorder %v136_v19, inf  ;;  %v142_v22 = vand.u32 2147483648, %v136_v19  ;;  %vm141_vm4 = vcmp.eq.f32.partialorder %v136_v19, 0.0 }
 0x104   :  { %v178_v20 = vpop.eup %177 }
 0x105   :  { %v138_v21 = vmul.f32 %v178_v20, %v136_v19 }
 0x107   :  { %v140_v24 = vsel %vm139_vm3, %v136_v19, %v138_v21 }
 0x108   :  { %v143_v25 = vsel %vm141_vm4, %v142_v22, %v140_v24 }
 0x109   :  { %v144_v26 = vmul.f32 %v143_v25, %v134_v23 }
 0x10b   :  { %146 = vst.msk [vmem:[#allocation5] sm:$0xff] %vm145_vm5, %v144_v26 }
 0x10c   :  { %212 = shalt.err (!%p209_p12)
}
 0x10d   :  { %s213_s8 = scalar_lea.hbm %s294_s4, 128 }
 0x10e   :  { %p214_p13 = scmp.ne.s32.totalorder %s294_s4, %s213_s8  ;;  %p217_p0 = scmp.lt.u32.totalorder %s213_s8, %s294_s4 }
 0x110   :  { %p219_p1 = pnand %p217_p0, %p214_p13 }
 0x112   :  { %222 = shalt.err (!%p219_p1)
}
 0x113   :  { %156 = dma.vmem_to_hbm [thread:$0]  %s154_s2, 128, %s294_s4, [#allocation4]  }
 0x114   :  { %225 = dma.done.wait [#allocation4], 128  }
 0x115   :  { %226 = vsyncadd [#allocation4], 4294967168 }
 0x116   :  { %160 = vsyncpa [#allocation3], 1 }
 0x117   :  { %161 = vsyncpa [#allocation4], 1 }

</bundles_post_ra>
